<compile_context>
chip_gen: v7x
topology: tpu7x:2x2x1
jax: 0.10.0
libtpu: 0.0.40
codegen_flags: <defaults>
</compile_context>

<pallas_src>
import jax
import jax.numpy as jnp
from jax.experimental import pallas as pl
from jax.experimental.pallas import tpu as pltpu


def _round_up(x, m):
    return ((x + m - 1) // m) * m


def mlp_kernel(x_ref, w1_ref, b1_ref, w2_ref, b2_ref, w3_ref, b3_ref, o_ref):
    # fc1 + ReLU   (x: [TB, 784] bf16, w1: [784, 128] bf16 -> f32 accumulate)
    h1 = jnp.dot(x_ref[...], w1_ref[...], preferred_element_type=jnp.float32)
    h1 = jnp.maximum(h1 + b1_ref[...], 0.0)
    # dropout(p=0.2) -> identity in eval mode
    # fc2 + ReLU   (w2: [128, 64]); cast activation to bf16 for native MXU input
    w2 = w2_ref[...]
    h2 = jnp.dot(h1.astype(w2.dtype), w2, preferred_element_type=jnp.float32)
    h2 = jnp.maximum(h2 + b2_ref[...], 0.0)
    # dropout(p=0.2) -> identity in eval mode
    # fc3 (logits); w3/b3 zero-padded to 128 lanes -> unmasked full-lane stores
    w3 = w3_ref[...]
    o_ref[...] = (
        jnp.dot(h2.astype(w3.dtype), w3, preferred_element_type=jnp.float32)
        + b3_ref[...]
    )


def simple_nn_forward(x_nchw, params, *, block_b=512, compute_dtype=jnp.bfloat16):
    """SimpleNN forward pass with a single fused, batch-tiled Pallas kernel.

    Args:
      x_nchw: [B, 1, 28, 28] input (NCHW, like PyTorch). Any float dtype;
              cast to `compute_dtype` for the kernel (produce it in bf16
              upstream to avoid the extra cast pass).
      params: dict with w1 (784,128), b1 (1,128), w2 (128,64), b2 (1,64),
              w3 (64,10), b3 (1,10). Weights stored (in, out): y = x @ W + b.
      block_b: max batch-tile size (rounded to a multiple of 8).
      compute_dtype: dtype fed to the MXU (accumulation is always f32).
    Returns:
      [B, 10] float32 logits.
    """
    B = x_nchw.shape[0]
    K = 28 * 28                       # 784 (no K padding: full-dim block is legal)
    H1 = params["w1"].shape[1]        # 128
    H2 = params["w2"].shape[1]        # 64
    C = params["w3"].shape[1]         # 10
    N_PAD = _round_up(C, 128)         # 128: lane-dense output stores

    x = x_nchw.reshape(B, K)
    if x.dtype != compute_dtype:
        x = x.astype(compute_dtype)   # ideally already bf16 upstream

    w1 = params["w1"].astype(compute_dtype)
    b1 = params["b1"].astype(jnp.float32)
    w2 = params["w2"].astype(compute_dtype)
    b2 = params["b2"].astype(jnp.float32)
    w3 = jnp.pad(params["w3"].astype(compute_dtype), ((0, 0), (0, N_PAD - C)))
    b3 = jnp.pad(params["b3"].astype(jnp.float32), ((0, 0), (0, N_PAD - C)))

    # Batch tile: large for HBM streaming efficiency, multiple of 8 (sublane),
    # but capped at ~ceil(B/2) so the "parallel" batch grid has >= 2 steps when
    # B allows it (both TensorCores get work on v7x). No batch padding: the
    # partial last block is masked by Pallas.
    TB = _round_up(block_b, 8)
    half_b = _round_up(pl.cdiv(B, 2), 8)
    TB = min(TB, max(half_b, 8))
    grid = (pl.cdiv(B, TB),)

    itemsize = jnp.dtype(compute_dtype).itemsize
    weight_bytes = itemsize * (K * H1 + H1 * H2 + H2 * N_PAD) + 4 * (H1 + H2 + N_PAD)
    cost = pl.CostEstimate(
        flops=2 * B * (K * H1 + H1 * H2 + H2 * N_PAD),
        transcendentals=0,
        bytes_accessed=B * K * itemsize + weight_bytes + B * N_PAD * 4,
    )

    out = pl.pallas_call(
        mlp_kernel,
        out_shape=jax.ShapeDtypeStruct((B, N_PAD), jnp.float32),
        grid=grid,
        in_specs=[
            # x: streamed per batch tile (double-buffered by the pipeline).
            # If profiling shows exposed DMA, add pipeline_mode=pl.Buffered(3).
            pl.BlockSpec((TB, K), lambda i: (i, 0)),
            # weights / biases: constant index_map -> resident in VMEM
            pl.BlockSpec((K, H1), lambda i: (0, 0)),
            pl.BlockSpec((1, H1), lambda i: (0, 0)),
            pl.BlockSpec((H1, H2), lambda i: (0, 0)),
            pl.BlockSpec((1, H2), lambda i: (0, 0)),
            pl.BlockSpec((H2, N_PAD), lambda i: (0, 0)),
            pl.BlockSpec((1, N_PAD), lambda i: (0, 0)),
        ],
        out_specs=pl.BlockSpec((TB, N_PAD), lambda i: (i, 0)),
        compiler_params=pltpu.CompilerParams(
            dimension_semantics=("parallel",),
        ),
        cost_estimate=cost,
    )(x, w1, b1, w2, b2, w3, b3)

    # Strip only the lane padding of the logits (batch was never padded).
    # If the consumer can take (B, 128) padded logits, return `out` directly.
    return out[:, :C]


def init_params(key, input_size=784, h1=128, h2=64, num_classes=10):
    """Deterministic PyTorch-Linear-style init: U(-1/sqrt(fan_in), 1/sqrt(fan_in))."""
    ks = jax.random.split(key, 6)

    def linear(kw, kb, fan_in, fan_out):
        bound = 1.0 / jnp.sqrt(fan_in)
        w = jax.random.uniform(kw, (fan_in, fan_out), jnp.float32, -bound, bound)
        b = jax.random.uniform(kb, (1, fan_out), jnp.float32, -bound, bound)
        return w, b

    w1, b1 = linear(ks[0], ks[1], input_size, h1)
    w2, b2 = linear(ks[2], ks[3], h1, h2)
    w3, b3 = linear(ks[4], ks[5], h2, num_classes)
    return {"w1": w1, "b1": b1, "w2": w2, "b2": b2, "w3": w3, "b3": b3}


if __name__ == "__main__":
    key = jax.random.PRNGKey(0)
    k_x, k_p = jax.random.split(key)

    batch = 2
    x = jax.random.normal(k_x, (batch, 1, 28, 28), dtype=jnp.float32)
    params = init_params(k_p)

    logits = simple_nn_forward(x, params)
    jax.block_until_ready(logits)

    # Pure-JAX f32 reference; kernel uses bf16 inputs with f32 accumulation,
    # so the tolerance is loosened accordingly.
    x_flat = x.reshape(batch, 784)
    ref = jnp.maximum(x_flat @ params["w1"] + params["b1"], 0.0)
    ref = jnp.maximum(ref @ params["w2"] + params["b2"], 0.0)
    ref = ref @ params["w3"] + params["b3"]
    assert logits.shape == (batch, 10)
    assert jnp.allclose(logits, ref, atol=3e-2, rtol=3e-2), (
        float(jnp.max(jnp.abs(logits - ref)))
    )

    # TODO(synk): training-mode dropout (p=0.2) would need pltpu.prng_seed /
    # pltpu.prng_random_bits masking inside the kernel; eval mode is identity.
    print("KERNEL_OK")
</pallas_src>

<mosaic_0001>
module attributes {stable_mosaic.version = 11 : i64} {
  func.func @mlp_kernel(%arg0: i32, %arg1: memref<8x784xbf16, #tpu.memory_space<vmem>>, %arg2: memref<784x128xbf16, #tpu.memory_space<vmem>>, %arg3: memref<1x128xf32, #tpu.memory_space<vmem>>, %arg4: memref<128x64xbf16, #tpu.memory_space<vmem>>, %arg5: memref<1x64xf32, #tpu.memory_space<vmem>>, %arg6: memref<64x128xbf16, #tpu.memory_space<vmem>>, %arg7: memref<1x128xf32, #tpu.memory_space<vmem>>, %arg8: memref<8x128xf32, #tpu.memory_space<vmem>>) attributes {dimension_semantics = [#tpu.dimension_semantics<parallel>], iteration_bounds = array<i64: 1>, scalar_prefetch = 0 : i64, scratch_operands = 0 : i64, tpu.core_type = #tpu.core_type<tc>, window_params = [{transform_indices = @transform_0, window_bounds = array<i64: 8, 784>}, {pipeline_mode = #tpu.pipeline_mode<synchronous>, transform_indices = @transform_1, window_bounds = array<i64: 784, 128>}, {pipeline_mode = #tpu.pipeline_mode<synchronous>, transform_indices = @transform_2, window_bounds = array<i64: 1, 128>}, {pipeline_mode = #tpu.pipeline_mode<synchronous>, transform_indices = @transform_3, window_bounds = array<i64: 128, 64>}, {pipeline_mode = #tpu.pipeline_mode<synchronous>, transform_indices = @transform_4, window_bounds = array<i64: 1, 64>}, {pipeline_mode = #tpu.pipeline_mode<synchronous>, transform_indices = @transform_5, window_bounds = array<i64: 64, 128>}, {pipeline_mode = #tpu.pipeline_mode<synchronous>, transform_indices = @transform_6, window_bounds = array<i64: 1, 128>}, {transform_indices = @transform_7, window_bounds = array<i64: 8, 128>}]} {
    %c0 = arith.constant 0 : index
    %c0_0 = arith.constant 0 : index
    %0 = vector.load %arg1[%c0, %c0_0] : memref<8x784xbf16, #tpu.memory_space<vmem>>, vector<8x784xbf16>
    %c0_1 = arith.constant 0 : index
    %c0_2 = arith.constant 0 : index
    %1 = vector.load %arg2[%c0_1, %c0_2] : memref<784x128xbf16, #tpu.memory_space<vmem>>, vector<784x128xbf16>
    %cst = arith.constant dense<0.000000e+00> : vector<8x128xf32>
    %2 = tpu.matmul %0, %1, %cst {dimension_numbers = #tpu.dot_dimension_numbers<[1], [0], [0], [1], [0, 0, 1, 1], [], []>} : vector<8x784xbf16>, vector<784x128xbf16>, vector<8x128xf32> -> vector<8x128xf32>
    %c0_3 = arith.constant 0 : index
    %c0_4 = arith.constant 0 : index
    %3 = vector.load %arg3[%c0_3, %c0_4] : memref<1x128xf32, #tpu.memory_space<vmem>>, vector<1x128xf32>
    %4 = vector.broadcast %3 : vector<1x128xf32> to vector<8x128xf32>
    %5 = arith.addf %2, %4 : vector<8x128xf32>
    %cst_5 = arith.constant 0.000000e+00 : f32
    %6 = vector.broadcast %cst_5 : f32 to vector<8x128xf32>
    %7 = arith.maximumf %5, %6 : vector<8x128xf32>
    %c0_6 = arith.constant 0 : index
    %c0_7 = arith.constant 0 : index
    %8 = vector.load %arg4[%c0_6, %c0_7] : memref<128x64xbf16, #tpu.memory_space<vmem>>, vector<128x64xbf16>
    %9 = arith.truncf %7 : vector<8x128xf32> to vector<8x128xbf16>
    %cst_8 = arith.constant dense<0.000000e+00> : vector<8x64xf32>
    %10 = tpu.matmul %9, %8, %cst_8 {dimension_numbers = #tpu.dot_dimension_numbers<[1], [0], [0], [1], [0, 0, 1, 1], [], []>} : vector<8x128xbf16>, vector<128x64xbf16>, vector<8x64xf32> -> vector<8x64xf32>
    %c0_9 = arith.constant 0 : index
    %c0_10 = arith.constant 0 : index
    %11 = vector.load %arg5[%c0_9, %c0_10] : memref<1x64xf32, #tpu.memory_space<vmem>>, vector<1x64xf32>
    %12 = vector.broadcast %11 : vector<1x64xf32> to vector<8x64xf32>
    %13 = arith.addf %10, %12 : vector<8x64xf32>
    %cst_11 = arith.constant 0.000000e+00 : f32
    %14 = vector.broadcast %cst_11 : f32 to vector<8x64xf32>
    %15 = arith.maximumf %13, %14 : vector<8x64xf32>
    %c0_12 = arith.constant 0 : index
    %c0_13 = arith.constant 0 : index
    %16 = vector.load %arg6[%c0_12, %c0_13] : memref<64x128xbf16, #tpu.memory_space<vmem>>, vector<64x128xbf16>
    %17 = arith.truncf %15 : vector<8x64xf32> to vector<8x64xbf16>
    %cst_14 = arith.constant dense<0.000000e+00> : vector<8x128xf32>
    %18 = tpu.matmul %17, %16, %cst_14 {dimension_numbers = #tpu.dot_dimension_numbers<[1], [0], [0], [1], [0, 0, 1, 1], [], []>} : vector<8x64xbf16>, vector<64x128xbf16>, vector<8x128xf32> -> vector<8x128xf32>
    %c0_15 = arith.constant 0 : index
    %c0_16 = arith.constant 0 : index
    %19 = vector.load %arg7[%c0_15, %c0_16] : memref<1x128xf32, #tpu.memory_space<vmem>>, vector<1x128xf32>
    %20 = vector.broadcast %19 : vector<1x128xf32> to vector<8x128xf32>
    %21 = arith.addf %18, %20 : vector<8x128xf32>
    %c0_17 = arith.constant 0 : index
    %c0_18 = arith.constant 0 : index
    %22 = vector.load %arg8[%c0_17, %c0_18] : memref<8x128xf32, #tpu.memory_space<vmem>>, vector<8x128xf32>
    tpu.vector_store %arg8[%c0_17, %c0_18], %21 {strides = array<i32>} : memref<8x128xf32, #tpu.memory_space<vmem>>, vector<8x128xf32>,
    return
  }
  func.func @transform_0(%arg0: i32) -> (i32, i32) {
    %c0_i32 = arith.constant 0 : i32
    %c0_i32_0 = arith.constant 0 : i32
    return %arg0, %c0_i32 : i32, i32
  }
  func.func @transform_1(%arg0: i32) -> (i32, i32) {
    %c0_i32 = arith.constant 0 : i32
    %c0_i32_0 = arith.constant 0 : i32
    %c0_i32_1 = arith.constant 0 : i32
    return %c0_i32, %c0_i32_0 : i32, i32
  }
  func.func @transform_2(%arg0: i32) -> (i32, i32) {
    %c0_i32 = arith.constant 0 : i32
    %c0_i32_0 = arith.constant 0 : i32
    %c0_i32_1 = arith.constant 0 : i32
    return %c0_i32, %c0_i32_0 : i32, i32
  }
  func.func @transform_3(%arg0: i32) -> (i32, i32) {
    %c0_i32 = arith.constant 0 : i32
    %c0_i32_0 = arith.constant 0 : i32
    %c0_i32_1 = arith.constant 0 : i32
    return %c0_i32, %c0_i32_0 : i32, i32
  }
  func.func @transform_4(%arg0: i32) -> (i32, i32) {
    %c0_i32 = arith.constant 0 : i32
    %c0_i32_0 = arith.constant 0 : i32
    %c0_i32_1 = arith.constant 0 : i32
    return %c0_i32, %c0_i32_0 : i32, i32
  }
  func.func @transform_5(%arg0: i32) -> (i32, i32) {
    %c0_i32 = arith.constant 0 : i32
    %c0_i32_0 = arith.constant 0 : i32
    %c0_i32_1 = arith.constant 0 : i32
    return %c0_i32, %c0_i32_0 : i32, i32
  }
  func.func @transform_6(%arg0: i32) -> (i32, i32) {
    %c0_i32 = arith.constant 0 : i32
    %c0_i32_0 = arith.constant 0 : i32
    %c0_i32_1 = arith.constant 0 : i32
    return %c0_i32, %c0_i32_0 : i32, i32
  }
  func.func @transform_7(%arg0: i32) -> (i32, i32) {
    %c0_i32 = arith.constant 0 : i32
    %c0_i32_0 = arith.constant 0 : i32
    return %arg0, %c0_i32 : i32, i32
  }
}

</mosaic_0001>

<bundles_post_ra>
// kernel: tpu_custom_call.1
= control target key start
LH: loop header
LB: loop body
LE: loop exit
PB: predicated region body
PF: predicated region fallthrough
CT: control target
= control target key end

     0   :  { %12 = vsyncpa [#allocation3], 0  ;;  %s1361_s0 = inlined_call_operand.vmem [shape: bf16[2,784], index: 0, kind: input, shape index: {}]   ;;  %s1362_s1 = inlined_call_operand.hbm [shape: bf16[784,128], index: 1, kind: input, shape index: {}]   ;;  %s1363_s2 = inlined_call_operand.vmem [shape: f32[1,128], index: 2, kind: input, shape index: {}]   ;;  %s1364_s3 = inlined_call_operand.vmem [shape: bf16[128,64], index: 3, kind: input, shape index: {}]   ;;  %s1365_s4 = inlined_call_operand.vmem [shape: f32[1,64], index: 4, kind: input, shape index: {}]   ;;  %s1366_s5 = inlined_call_operand.vmem [shape: bf16[64,128], index: 5, kind: input, shape index: {}]   ;;  %s1367_s6 = inlined_call_operand.vmem [shape: f32[1,128], index: 6, kind: input, shape index: {}]   ;;  %s1368_s7 = inlined_call_operand.hbm [shape: f32[2,128], index: 7, kind: output, shape index: {}]  }
   0x1   :  { %13 = vsyncpa [#allocation4], 0  ;;  %s1212_s24 = smov [#allocation2]   ;;  %s1164_s28 = scalar_lea.hbm %s1362_s1, 6272 }
   0x2   :  { %s21_s25 = sshll.u32 %s1212_s24, 4  ;;  %p1165_p0 = scmp.ne.s32.totalorder %s1362_s1, %s1164_s28  ;;  %s22_s25 = int_to_ptr.vmem [resolvable:$true] %s21_s25 }
   0x3   :  { %p1168_p1 = scmp.lt.u32.totalorder %s1164_s28, %s1362_s1 }
   0x5   :  { %p1170_p2 = pnand %p1168_p1, %p1165_p0 }
   0x7   :  { %1173 = shalt.err (!%p1170_p2)
}
   0x8   :  { %s1174_s10 = scalar_lea.vmem %s22_s25, 6272  ;;  %p1179_p4 = scmp.lt.s32.totalorder %s22_s25, %s22_s25 }
   0x9   :  { %p1175_p3 = scmp.ne.s32.totalorder %s22_s25, %s1174_s10  ;;  %p1180_p5 = scmp.lt.s32.totalorder %s1174_s10, %s1174_s10 }
   0xb   :  { %p1181_p6 = por %p1180_p5, %p1179_p4 }
   0xd   :  { %p1182_p7 = pnand %p1181_p6, %p1175_p3 }
   0xf   :  { %1185 = shalt.err (!%p1182_p7)
}
  0x10   :  { %s1213_s11 = smov 64   ;;  %s1214_s12 = smov 4  }
  0x11   :  { %27 = dma.hbm_to_vmem [thread:$0]  %s1362_s1, 6272, %s22_s25, [#allocation3], %s1213_s11, %s1213_s11, %s1214_s12  }
  0x12   :  { %1208 = dma.done.wait [#allocation3], 6272  }
  0x13   :  { %1209 = vsyncadd [#allocation3], 4294961024  ;;  %v1097_v0 = vld [vmem:[#allocation2 + $0x40] sm:$0xff]   ;;  %v1101_v4 = vld [vmem:[#allocation2 + $0x48] sm:$0xff]   ;;  %v1215_v23 = vmov 1966171168   ;;  %v162_v25 = vlaneseq }
  0x14   :  { %v1098_v1 = vld [vmem:[#allocation2] sm:$0xff]   ;;  %968 = vmatprep.subr.bf16.mxu0 %v1097_v0  ;;  %v1102_v5 = vld [vmem:[#allocation2 + $0x8] sm:$0xff]   ;;  %v1105_v8 = vld [vmem:[#allocation2 + $0x50] sm:$0xff]   ;;  %v160_v24 = vunpack.c.l.s4 %v1215_v23  ;;  %v1216_v49 = vmov 0.0   ;;  %vm1217_vm0 = vmmov 0   ;;  %vm522_vm1 = vcmask 130048  }
  0x15   :  { %v1099_v2 = vld [vmem:[#allocation2 + $0xc0] sm:$0xff]   ;;  %969 = vmatpush3.bf16.msra.mxu0 %v1098_v1  ;;  %v1103_v6 = vld [vmem:[#allocation2 + $0xc8] sm:$0xff]   ;;  %v1106_v9 = vld [vmem:[#allocation2 + $0x10] sm:$0xff]   ;;  %v163_v31 = vshrl.u32 %v162_v25, 7  ;;  %vm840_vm2 = vcmask 523264  }
  0x16   :  { %v1100_v3 = vld [vmem:[#allocation2 + $0x80] sm:$0xff]   ;;  %990 = vmatprep.subr.bf16.mxu1 %v1099_v2  ;;  %970 = vmatprep.subr.bf16.mxu0 %v1101_v4  ;;  %v1104_v7 = vld [vmem:[#allocation2 + $0x88] sm:$0xff]   ;;  %v1107_v10 = vld [vmem:[#allocation2 + $0xd0] sm:$0xff]   ;;  %v161_v30 = vunpack.c.0.s8 %v160_v24 }
  0x17   :  { %991 = vmatpush3.bf16.msra.mxu1 %v1100_v3  ;;  %v1108_v11 = vld [vmem:[#allocation2 + $0x90] sm:$0xff]   ;;  %v1109_v12 = vld [vmem:[#allocation2 + $0x58] sm:$0xff]   ;;  %v1113_v16 = vld [vmem:[#allocation2 + $0x60] sm:$0xff]  }
  0x18   :  { %992 = vmatprep.subr.bf16.mxu1 %v1103_v6  ;;  %v1110_v13 = vld [vmem:[#allocation2 + $0x18] sm:$0xff]   ;;  %v1114_v17 = vld [vmem:[#allocation2 + $0x20] sm:$0xff]   ;;  %v1117_v20 = vld [vmem:[#allocation2 + $0x68] sm:$0xff]   ;;  %v164_v36 = vsub.s32 %v161_v30, %v163_v31 }
  0x19   :  { %971 = vmatpush3.bf16.msra.mxu0 %v1102_v5  ;;  %v1111_v14 = vld [vmem:[#allocation2 + $0xd8] sm:$0xff]   ;;  %v1115_v18 = vld [vmem:[#allocation2 + $0xe0] sm:$0xff]   ;;  %v1118_v21 = vld [vmem:[#allocation2 + $0x28] sm:$0xff]  }
  0x1a   :  { %972 = vmatprep.subr.bf16.mxu0 %v1105_v8  ;;  %v1112_v15 = vld [vmem:[#allocation2 + $0x98] sm:$0xff]   ;;  %v1116_v19 = vld [vmem:[#allocation2 + $0xa0] sm:$0xff]   ;;  %v1119_v22 = vld [vmem:[#allocation2 + $0xe8] sm:$0xff]  }
  0x1b   :  { %993 = vmatpush3.bf16.msra.mxu1 %v1104_v7  ;;  %v1120_v26 = vld [vmem:[#allocation2 + $0xa8] sm:$0xff]   ;;  %v1121_v27 = vld [vmem:[#allocation2 + $0x70] sm:$0xff]   ;;  %v1125_v33 = vld [vmem:[#allocation2 + $0x78] sm:$0xff]  }
  0x1c   :  { %994 = vmatprep.subr.bf16.mxu1 %v1107_v10  ;;  %v1122_v28 = vld [vmem:[#allocation2 + $0x30] sm:$0xff]   ;;  %v1126_v34 = vld [vmem:[#allocation2 + $0x38] sm:$0xff]   ;;  %v1128_v37 = vld [vmem:[%s1361_s0] ss:$7 sps:$4 sm:$0xff]  }
  0x1d   :  { %973 = vmatpush3.bf16.msra.mxu0 %v1106_v9  ;;  %v1123_v29 = vld [vmem:[#allocation2 + $0xf0] sm:$0xff]   ;;  %v1127_v35 = vld [vmem:[#allocation2 + $0xf8] sm:$0xff]   ;;  %v1130_v39 = vld [vmem:[%s1361_s0 + $0x4] ss:$7 sps:$4 sm:$0x77]   ;;  %v165_v41 = vrot.slane %v1128_v37, %v164_v36 }
  0x1e   :  { %974 = vmatprep.subr.bf16.mxu0 %v1109_v12  ;;  %v1124_v32 = vld [vmem:[#allocation2 + $0xb0] sm:$0xff]   ;;  %v1134_v43 = vld [vmem:[#allocation2 + $0xb8] sm:$0xff]   ;;  %v1135_v44 = vld [vmem:[#allocation2 + $0x140] sm:$0xff]   ;;  %v172_v45 = vrot.slane %v1130_v39, %v164_v36 }
  0x1f   :  { %995 = vmatpush3.bf16.msra.mxu1 %v1108_v11  ;;  %v1131_v38 = vld [vmem:[%s1361_s0 + $0xe] ss:$7 sps:$4 sm:$0xff]   ;;  %v1133_v40 = vld [vmem:[%s1361_s0 + $0x12] ss:$7 sps:$4 sm:$0x77]   ;;  %v1136_v53 = vld [vmem:[#allocation2 + $0x100] sm:$0xff]  }
  0x20   :  { %996 = vmatprep.subr.bf16.mxu1 %v1111_v14  ;;  %v179_v42 = vrot.slane %v1131_v38, %v164_v36  ;;  %v186_v46 = vrot.slane %v1133_v40, %v164_v36  ;;  %v1137_v54 = vld [vmem:[#allocation2 + $0x148] sm:$0xff]   ;;  %v1139_v59 = vld [vmem:[#allocation2 + $0x150] sm:$0xff]   ;;  %v1141_v62 = vld [vmem:[#allocation2 + $0x158] sm:$0xff]  }
  0x21   :  { %975 = vmatpush3.bf16.msra.mxu0 %v1110_v13  ;;  %v1138_v58 = vld [vmem:[#allocation2 + $0x108] sm:$0xff]   ;;  %v1140_v61 = vld [vmem:[#allocation2 + $0x110] sm:$0xff]   ;;  %v1142_v0 = vld [vmem:[#allocation2 + $0x118] sm:$0xff]  }
  0x22   :  { %976 = vmatprep.subr.bf16.mxu0 %v1113_v16  ;;  %v188_v47 = vcombine.high %v165_v41, %v179_v42  ;;  %v187_v48 = vcombine.low %v165_v41, %v179_v42  ;;  %v190_v50 = vcombine.high %v172_v45, %v186_v46  ;;  %v189_v60 = vcombine.low %v172_v45, %v186_v46  ;;  %v1143_v1 = vld [vmem:[#allocation2 + $0x160] sm:$0xff]   ;;  %v1145_v5 = vld [vmem:[#allocation2 + $0x168] sm:$0xff]   ;;  %v1147_v7 = vld [vmem:[#allocation2 + $0x170] sm:$0xff]  }
  0x23   :  { %997 = vmatpush3.bf16.msra.mxu1 %v1112_v15  ;;  %v1151_v2 = vld [vmem:[#allocation2 + $0x180] sm:$0xff]   ;;  %v1146_v6 = vld [vmem:[#allocation2 + $0x128] sm:$0xff]   ;;  %v1148_v8 = vld [vmem:[#allocation2 + $0x130] sm:$0xff]  }
  0x24   :  { %998 = vmatprep.subr.bf16.mxu1 %v1115_v18  ;;  %v211_v51 = vrot.slane %v188_v47, %v164_v36  ;;  %v197_v52 = vrot.slane %v187_v48, %v164_v36  ;;  %v218_v57 = vrot.slane %v190_v50, %v164_v36  ;;  %v204_v63 = vrot.slane %v189_v60, %v164_v36  ;;  %v1144_v3 = vld [vmem:[#allocation2 + $0x120] sm:$0xff]   ;;  %v1149_v9 = vld [vmem:[#allocation2 + $0x178] sm:$0xff]   ;;  %v1153_v12 = vld [vmem:[%s1364_s3 + $0x8] sm:$0xff]  }
  0x25   :  { %977 = vmatpush3.bf16.msra.mxu0 %v1114_v17  ;;  %v1150_v10 = vld [vmem:[#allocation2 + $0x138] sm:$0xff]   ;;  %v1152_v11 = vld [vmem:[%s1364_s3] sm:$0xff]   ;;  %v1154_v13 = vld [vmem:[%s1364_s3 + $0x10] sm:$0xff]  }
  0x26   :  { %978 = vmatprep.subr.bf16.mxu0 %v1117_v20  ;;  %558 = vmatprep.mubr.bf16.mxu0 %v211_v51  ;;  %v221_v55 = vcombine.high %v211_v51, %v211_v51  ;;  %v219_v56 = vcombine.high %v197_v52, %v197_v52  ;;  %v220_v4 = vcombine.high %v204_v63, %v204_v63  ;;  %v1155_v14 = vld [vmem:[%s1364_s3 + $0x18] sm:$0xff]   ;;  %v1156_v15 = vld [vmem:[%s1364_s3 + $0x20] sm:$0xff]   ;;  %v1157_v16 = vld [vmem:[%s1364_s3 + $0x28] sm:$0xff]  }
  0x27   :  { %999 = vmatpush3.bf16.msra.mxu1 %v1116_v19  ;;  %v1158_v17 = vld [vmem:[%s1364_s3 + $0x30] sm:$0xff]   ;;  %v1159_v18 = vld [vmem:[%s1364_s3 + $0x38] sm:$0xff]   ;;  %v1160_v19 = vld [vmem:[%s1366_s5] sm:$0xff]  }
  0x28   :  { %1000 = vmatprep.subr.bf16.mxu1 %v1119_v22  ;;  %598 = vmatprep.mubr.bf16.mxu1 %v221_v55  ;;  %v1161_v20 = vld [vmem:[%s1366_s5 + $0x8] sm:$0xff]   ;;  %v902_v22 = vld [vmem:[%s1363_s2] ss:$0 sm:$0xff]  ;;  %v1162_v47 = vld [vmem:[%s1366_s5 + $0x10] sm:$0xff]  }
  0x29   :  { %979 = vmatpush3.bf16.msra.mxu0 %v1118_v21  ;;  %v1163_v48 = vld [vmem:[%s1366_s5 + $0x18] sm:$0xff]   ;;  %v953_v50 = vld [vmem:[%s1365_s4] ss:$0 sm:$0xff] }
  0x2a   :  { %980 = vmatprep.subr.bf16.mxu0 %v1121_v27 }
  0x2b   :  { %1001 = vmatpush3.bf16.msra.mxu1 %v1120_v26 }
  0x2c   :  { %1002 = vmatprep.subr.bf16.mxu1 %v1123_v29 }
  0x2d   :  { %981 = vmatpush3.bf16.msra.mxu0 %v1122_v28 }
  0x2e   :  { %982 = vmatprep.subr.bf16.mxu0 %v1125_v33 }
  0x2f   :  { %1003 = vmatpush3.bf16.msra.mxu1 %v1124_v32 }
  0x30   :  { %1004 = vmatprep.subr.bf16.mxu1 %v1127_v35 }
  0x31   :  { %983 = vmatpush3.bf16.msra.mxu0 %v1126_v34 }
  0x32   :  { %1012 = vmatprep.subr.bf16.mxu0 %v1135_v44 }
  0x33   :  { %1005 = vmatpush3.bf16.msra.mxu1 %v1134_v43 }
  0x34   :  { %1050 = vmatprep.subr.bf16.mxu1 %v1216_v49  ;;  %559 = vmatmul.mubr.bf16.vlgmr.msra.gmra.mrb[0].mxu0 %v197_v52 }
  0x35   :  { %1013 = vmatpush3.bf16.msra.mxu0 %v1136_v53  ;;  %638 = vmatprep.mubr.bf16.mxu0 %v218_v57 }
  0x36   :  { %599 = vmatmul.mubr.bf16.vlgmr.msra.gmra.mrb[0].mxu1 %v219_v56  ;;  %1014 = vmatprep.subr.bf16.mxu0 %v1137_v54 }
  0x37   :  { %1052 = vmatprep.mubr.msk.bf16.mxu1 %vm1217_vm0, %v1216_v49  ;;  %1051 = vmatpush3.bf16.msra.mxu1 %v1151_v2 }
  0x38   :  { %1056 = vmatprep.subr.bf16.mxu1 %v1216_v49 }
  0x39   :  { %1015 = vmatpush3.bf16.msra.mxu0 %v1138_v58 }
  0x3a   :  { %1016 = vmatprep.subr.bf16.mxu0 %v1139_v59 }
  0x3d   :  { %1017 = vmatpush3.bf16.msra.mxu0 %v1140_v61 }
  0x3e   :  { %1018 = vmatprep.subr.bf16.mxu0 %v1141_v62  ;;  %1053 = vmatmul.mubr.msk.bf16.vlgmr.msra.gmra.mrb[4].mxu1 %vm522_vm1, %v220_v4 }
  0x3f   :  { %1072 = vmatprep.mubr.msk.bf16.mxu1 %vm1217_vm0, %v1216_v49  ;;  %1057 = vmatpush3.bf16.msra.mxu1 %v1152_v11 }
  0x40   :  { %1058 = vmatprep.subr.bf16.mxu1 %v1216_v49 }
  0x41   :  { %1019 = vmatpush3.bf16.msra.mxu0 %v1142_v0 }
  0x42   :  { %1020 = vmatprep.subr.bf16.mxu0 %v1143_v1 }
  0x43   :  { %1059 = vmatpush3.bf16.msra.mxu1 %v1153_v12 }
  0x44   :  { %1060 = vmatprep.subr.bf16.mxu1 %v1216_v49 }
  0x45   :  { %1021 = vmatpush3.bf16.msra.mxu0 %v1144_v3 }
  0x46   :  { %1022 = vmatprep.subr.bf16.mxu0 %v1145_v5 }
  0x47   :  { %1061 = vmatpush3.bf16.msra.mxu1 %v1154_v13 }
  0x48   :  { %1062 = vmatprep.subr.bf16.mxu1 %v1216_v49 }
  0x49   :  { %1023 = vmatpush3.bf16.msra.mxu0 %v1146_v6 }
  0x4a   :  { %1024 = vmatprep.subr.bf16.mxu0 %v1147_v7 }
  0x4b   :  { %1063 = vmatpush3.bf16.msra.mxu1 %v1155_v14 }
  0x4c   :  { %1064 = vmatprep.subr.bf16.mxu1 %v1216_v49 }
  0x4d   :  { %1025 = vmatpush3.bf16.msra.mxu0 %v1148_v8 }
  0x4e   :  { %1026 = vmatprep.subr.bf16.mxu0 %v1149_v9 }
  0x4f   :  { %1065 = vmatpush3.bf16.msra.mxu1 %v1156_v15 }
  0x50   :  { %1066 = vmatprep.subr.bf16.mxu1 %v1216_v49 }
  0x51   :  { %1027 = vmatpush3.bf16.msra.mxu0 %v1150_v10 }
  0x52   :  { %1076 = vmatprep.subr.bf16.mxu0 %v1216_v49 }
  0x53   :  { %1067 = vmatpush3.bf16.msra.mxu1 %v1157_v16 }
  0x54   :  { %639 = vmatmul.mubr.bf16.vlgmr.msra.gmra.mrb[4].mxu0 %v204_v63  ;;  %1068 = vmatprep.subr.bf16.mxu1 %v1216_v49 }
  0x55   :  { %1084 = vmatprep.mubr.msk.bf16.mxu0 %vm1217_vm0, %v1216_v49  ;;  %1077 = vmatpush3.bf16.msra.mxu0 %v1160_v19 }
  0x56   :  { %1078 = vmatprep.subr.bf16.mxu0 %v1216_v49 }
  0x57   :  { %1069 = vmatpush3.bf16.msra.mxu1 %v1158_v17 }
  0x58   :  { %1070 = vmatprep.subr.bf16.mxu1 %v1216_v49 }
  0x59   :  { %1079 = vmatpush3.bf16.msra.mxu0 %v1161_v20 }
  0x5a   :  { %1080 = vmatprep.subr.bf16.mxu0 %v1216_v49 }
  0x5b   :  { %1071 = vmatpush3.bf16.msra.mxu1 %v1159_v18 }
  0x5d   :  { %1081 = vmatpush3.bf16.msra.mxu0 %v1162_v47 }
  0x5e   :  { %1082 = vmatprep.subr.bf16.mxu0 %v1216_v49  ;;  %v962_v49 = vld [vmem:[%s1367_s6] ss:$0 sm:$0xff] }
  0x61   :  { %1083 = vmatpush3.bf16.msra.mxu0 %v1163_v48 }
 0x107   :  { %v984_v21 = vpop.f32.mrb[0].mxu0 }
 0x108   :  { %v985_v23 = vpop.f32.mrb[1].mxu0 }
 0x109   :  { %v986_v24 = vadd.f32 %v985_v23, %v984_v21  ;;  %v987_v25 = vpop.f32.mrb[2].mxu0  ;;  %v1006_v26 = vpop.f32.mrb[0].mxu1 }
 0x10a   :  { %v988_v27 = vpop.f32.mrb[3].mxu0  ;;  %v1007_v28 = vpop.f32.mrb[1].mxu1 }
 0x10b   :  { %v561_v29 = vadd.f32 %v986_v24, %v902_v22  ;;  %v1008_v30 = vadd.f32 %v1007_v28, %v1006_v26  ;;  %v1009_v31 = vpop.f32.mrb[2].mxu1 }
 0x10c   :  { %v1010_v32 = vpop.f32.mrb[3].mxu1 }
 0x10d   :  { %v601_v33 = vadd.f32 %v1008_v30, %v561_v29 }
 0x111   :  { %v680_v34 = vpop.f32.mrb[4].mxu1 }
 0x112   :  { %v1054_v35 = vpop.f32.mrb[5].mxu1 }
 0x113   :  { %v683_v36 = vpop.f32.mrb[6].mxu1 }
 0x114   :  { %v1055_v37 = vpop.f32.mrb[7].mxu1 }
 0x127   :  { %v1028_v38 = vpop.f32.mrb[4].mxu0 }
 0x128   :  { %v1029_v39 = vpop.f32.mrb[5].mxu0 }
 0x129   :  { %v1030_v40 = vadd.f32 %v1029_v39, %v1028_v38  ;;  %v1031_v41 = vpop.f32.mrb[6].mxu0 }
 0x12a   :  { %v1032_v42 = vpop.f32.mrb[7].mxu0 }
 0x12b   :  { %v641_v43 = vadd.f32 %v1030_v40, %v601_v33 }
 0x12d   :  { %v681_v44 = vadd.f32 %v680_v34, %v641_v43 }
 0x12f   :  { %v686_v45 = vmax.f32 %v681_v44, 0.0 }
 0x131   :  { %v703_v46 = vpack.c.bf16 %v686_v45, %v686_v45 }
 0x133   :  { %1073 = vmatmul.mubr.bf16.vlgmr.msra.gmra.mrb[8].mxu1 %v703_v46 }
 0x206   :  { %v793_v51 = vpop.f32.mrb[8].mxu1 }
 0x207   :  { %v794_v52 = vadd.f32 %v953_v50, %v793_v51  ;;  %v1074_v53 = vpop.f32.mrb[9].mxu1 }
 0x208   :  { %v796_v54 = vpop.f32.mrb[10].mxu1 }
 0x209   :  { %v799_v55 = vmax.f32 %v794_v52, 0.0  ;;  %v1075_v56 = vpop.f32.mrb[11].mxu1 }
 0x20b   :  { %v808_v57 = vpack.c.bf16 %v799_v55, %v799_v55 }
 0x20d   :  { %1085 = vmatmul.mubr.msk.bf16.vlgmr.msra.gmra.mrb[8].mxu0 %vm840_vm2, %v808_v57 }
 0x2e0   :  { %v878_v58 = vpop.f32.mrb[8].mxu0 }
 0x2e1   :  { %v879_v59 = vadd.f32 %v962_v49, %v878_v58  ;;  %v1086_v60 = vpop.f32.mrb[9].mxu0 }
 0x2e2   :  { %v881_v61 = vpop.f32.mrb[10].mxu0 }
 0x2e3   :  { %884 = vst [vmem:[#allocation5] sm:$0xff] %v879_v59  ;;  %v1087_v62 = vpop.f32.mrb[11].mxu0 }
 0x2e4   :  { %889 = vsyncadd [#allocation4], 96  ;;  %s1218_s4 = smov [#allocation5]  }
 0x2e5   :  { %s890_s5 = sshll.u32 %s1218_s4, 4  ;;  %s891_s5 = int_to_ptr.vmem [resolvable:$true] %s890_s5 }
 0x2e6   :  { %s1186_s24 = scalar_lea.vmem %s891_s5, 32  ;;  %s1190_s25 = scalar_lea.vmem %s891_s5, 128 }
 0x2e7   :  { %p1187_p8 = scmp.ne.s32.totalorder %s891_s5, %s1186_s24  ;;  %p1191_p9 = scmp.lt.s32.totalorder %s891_s5, %s891_s5 }
 0x2e8   :  { %p1192_p10 = scmp.lt.s32.totalorder %s1190_s25, %s1186_s24 }
 0x2ea   :  { %p1193_p11 = por %p1192_p10, %p1191_p9 }
 0x2ec   :  { %p1194_p12 = pnand %p1193_p11, %p1187_p8 }
 0x2ee   :  { %1197 = shalt.err (!%p1194_p12)
}
 0x2ef   :  { %s1198_s27 = scalar_lea.hbm %s1368_s7, 32 }
 0x2f0   :  { %p1199_p13 = scmp.ne.s32.totalorder %s1368_s7, %s1198_s27  ;;  %p1202_p0 = scmp.lt.u32.totalorder %s1198_s27, %s1368_s7 }
 0x2f2   :  { %p1204_p1 = pnand %p1202_p0, %p1199_p13 }
 0x2f4   :  { %1207 = shalt.err (!%p1204_p1)
}
 0x2f5   :  { %s1219_s9 = smov 32   ;;  %s1220_s10 = smov 2  }
 0x2f6   :  { %896 = dma.vmem_to_hbm [thread:$0]  %s891_s5, 32, %s1368_s7, [#allocation4], %s1219_s9, %s1219_s9, %s1220_s10  }
 0x2f7   :  { %1210 = dma.done.wait [#allocation4], 128  }
 0x2f8   :  { %1211 = vsyncadd [#allocation4], 4294967168 }
 0x2f9   :  { %900 = vsyncpa [#allocation3], 1 }
 0x2fa   :  { %901 = vsyncpa [#allocation4], 1 }

</bundles_post_ra>
